<compile_context>
chip_gen: v5e
topology: v5e:2x2
jax: 0.10.0
libtpu: 0.0.40
codegen_flags: <defaults>
</compile_context>

<pallas_src>
import jax
import jax.numpy as jnp
from jax.experimental import pallas as pl
from jax.experimental.pallas import tpu as pltpu


# ----------------------- generation-aware VMEM config -------------------------
def _vmem_config():
    """Returns (scoped vmem_limit_bytes, per-tile budget bytes)."""
    cap = 64 * 1024 * 1024                     # conservative default (v7x per-TC)
    try:
        cap = int(pltpu.get_tpu_info().vmem_capacity_bytes)
    except Exception:
        pass
    if cap >= 128 * 1024 * 1024:               # v5e / v6e: 128 MiB physical VMEM
        return 96 * 1024 * 1024, 6 * 1024 * 1024
    # v7x: 64 MiB per TensorCore -- keep pipelining headroom, do NOT copy v6e sizes
    return 48 * 1024 * 1024, 3 * 1024 * 1024


# --------------------------- fused single-pass kernel -------------------------
def _make_fused_kernel(eps, n_elems):
    inv_n = 1.0 / float(n_elems)
    inv_nm1 = 1.0 / float(max(n_elems - 1, 1))   # unbiased (torch Tensor.var default)

    def kernel(x_ref, g_ref, b_ref, o_ref):
        x = x_ref[...].astype(jnp.float32)                         # (G, cg, HW)
        s = jnp.sum(jnp.sum(x, axis=2, keepdims=True),
                    axis=1, keepdims=True)                         # (G, 1, 1)
        mean = s * inv_n
        d = x - mean                                               # centered; reused for output
        ss = jnp.sum(jnp.sum(d * d, axis=2, keepdims=True),
                     axis=1, keepdims=True)                        # true two-pass variance
        var = ss * inv_nm1
        scale = g_ref[...] * jax.lax.rsqrt(var + eps)              # (G, cg, 1)
        o_ref[...] = (d * scale + b_ref[...]).astype(o_ref.dtype)

    return kernel


# ------------------------- fallback pass 1: lane-partial stats -----------------
def _make_stats_kernel(lane_chunks):
    def kernel(x_ref, s_ref, q_ref):
        @pl.when(pl.program_id(1) == 0)
        def _init():
            s_ref[...] = jnp.zeros_like(s_ref)
            q_ref[...] = jnp.zeros_like(q_ref)

        shape = s_ref.shape                                        # (G, cg, 128)

        def chunk_at(off):
            return x_ref[:, :, pl.ds(off, 128)].astype(jnp.float32)

        # Lane-partial accumulation: pure VPU adds in the hot loop; the single
        # cross-lane reduction happens in plain JAX in the wrapper epilogue.
        if lane_chunks <= 16:                                      # static unroll
            s_acc = jnp.zeros(shape, jnp.float32)
            q_acc = jnp.zeros(shape, jnp.float32)
            for j in range(lane_chunks):
                c = chunk_at(j * 128)
                s_acc = s_acc + c
                q_acc = q_acc + c * c
        else:                                                      # bounded trace size
            def body(j, carry):
                s_a, q_a = carry
                c = chunk_at(pl.multiple_of(j * 128, 128))
                return s_a + c, q_a + c * c
            s_acc, q_acc = jax.lax.fori_loop(
                0, lane_chunks, body,
                (jnp.zeros(shape, jnp.float32), jnp.zeros(shape, jnp.float32)))

        s_ref[...] += s_acc
        q_ref[...] += q_acc

    return kernel


# ----------------------------- fallback pass 2: apply --------------------------
def _apply_kernel(x_ref, scale_ref, shift_ref, o_ref):
    x = x_ref[...].astype(jnp.float32)                             # (G, cg, T)
    o_ref[...] = (x * scale_ref[...] + shift_ref[...]).astype(o_ref.dtype)


# ------------------------------------ wrapper ----------------------------------
def group_norm(x, weight, bias, group, eps=1e-5,
               force_two_pass=False, tile_budget_bytes=None):
    """Forward of the custom PyTorch GroupNorm module. x: (N, C, H, W)."""
    N, C, H, W = x.shape
    assert C % group == 0
    G = group
    cg = C // G
    HW = H * W
    n_elems = cg * HW
    itemsize = jnp.dtype(x.dtype).itemsize

    vmem_limit, default_tile_budget = _vmem_config()
    tile_budget = tile_budget_bytes if tile_budget_bytes is not None else default_tile_budget

    x4 = x.reshape(N, G, cg, HW)
    gamma = weight.reshape(G, cg, 1).astype(jnp.float32)
    beta = bias.reshape(G, cg, 1).astype(jnp.float32)

    # ----------------- fused single-pass path (whole image resident) -----------
    # residency: double-buffered input + output blocks plus in-kernel f32 temps
    fused_resident = 4 * C * HW * itemsize + 3 * C * HW * 4
    if not force_two_pass and fused_resident <= int(0.9 * vmem_limit):
        cost = pl.CostEstimate(flops=8 * N * C * HW,
                               transcendentals=N * G,
                               bytes_accessed=2 * N * C * HW * itemsize)
        y4 = pl.pallas_call(
            _make_fused_kernel(float(eps), n_elems),
            out_shape=jax.ShapeDtypeStruct((N, G, cg, HW), x.dtype),
            grid=(N,),
            in_specs=[
                pl.BlockSpec((None, G, cg, HW), lambda n: (n, 0, 0, 0)),
                pl.BlockSpec((G, cg, 1), lambda n: (0, 0, 0)),
                pl.BlockSpec((G, cg, 1), lambda n: (0, 0, 0)),
            ],
            out_specs=pl.BlockSpec((None, G, cg, HW), lambda n: (n, 0, 0, 0)),
            compiler_params=pltpu.CompilerParams(
                dimension_semantics=("parallel",),
                vmem_limit_bytes=vmem_limit),
            cost_estimate=cost,
        )(x4, gamma, beta)
        return y4.reshape(N, C, H, W)

    # --------------------- two-pass fallback (large images) --------------------
    # zero-pad HW to a multiple of 128 (zeros do not perturb sum/sumsq; mean/var
    # still use the true n_elems; the padded output region is sliced away below)
    HW_pad = ((HW + 127) // 128) * 128
    if HW_pad != HW:
        x4 = jnp.pad(x4, ((0, 0), (0, 0), (0, 0), (0, HW_pad - HW)))

    # largest lane-dense tile fitting the generation budget (dtype-aware; the
    # apply pass holds ~4x tile: double-buffered input + output)
    divisors = [t for t in range(128, HW_pad + 1, 128) if HW_pad % t == 0]
    fitting = [t for t in divisors if C * t * itemsize <= tile_budget]
    T = max(fitting) if fitting else 128
    nt = HW_pad // T

    # Split the HW-tile axis across programs when N alone can't feed both v7x
    # TensorCores; partial sums are combined in the wrapper epilogue.
    split = 2 if (N == 1 and nt >= 2 and nt % 2 == 0) else 1
    tpb = nt // split

    stats_cost = pl.CostEstimate(flops=3 * N * C * HW_pad,
                                 transcendentals=0,
                                 bytes_accessed=N * C * HW_pad * itemsize)
    s_part, q_part = pl.pallas_call(
        _make_stats_kernel(T // 128),
        out_shape=(jax.ShapeDtypeStruct((N * split, G, cg, 128), jnp.float32),
                   jax.ShapeDtypeStruct((N * split, G, cg, 128), jnp.float32)),
        grid=(N * split, tpb),
        in_specs=[
            pl.BlockSpec((None, G, cg, T),
                         lambda p, t: (p // split, 0, 0, (p % split) * tpb + t)),
        ],
        out_specs=(
            pl.BlockSpec((None, G, cg, 128), lambda p, t: (p, 0, 0, 0)),
            pl.BlockSpec((None, G, cg, 128), lambda p, t: (p, 0, 0, 0)),
        ),
        compiler_params=pltpu.CompilerParams(
            dimension_semantics=("parallel", "arbitrary"),
            vmem_limit_bytes=vmem_limit),
        cost_estimate=stats_cost,
    )(x4)

    # Group stats + (scale, shift) fold: tiny O(N*C) plain-JAX epilogue.
    gsum = s_part.reshape(N, split, G, cg * 128).sum(axis=(1, 3))          # (N, G)
    gsq = q_part.reshape(N, split, G, cg * 128).sum(axis=(1, 3))
    mean = gsum / float(n_elems)
    # TODO(synk): E[x^2] - mean^2 can lose precision for large-mean inputs.
    var = (gsq - gsum * mean) / float(max(n_elems - 1, 1))                 # unbiased
    inv = jax.lax.rsqrt(var + eps)
    scale = weight.reshape(1, G, cg).astype(jnp.float32) * inv[:, :, None]  # (N, G, cg)
    shift = bias.reshape(1, G, cg).astype(jnp.float32) - mean[:, :, None] * scale
    scale4 = scale.reshape(N, G, cg, 1)
    shift4 = shift.reshape(N, G, cg, 1)

    apply_cost = pl.CostEstimate(flops=2 * N * C * HW_pad,
                                 transcendentals=0,
                                 bytes_accessed=2 * N * C * HW_pad * itemsize)
    y4 = pl.pallas_call(
        _apply_kernel,
        out_shape=jax.ShapeDtypeStruct((N, G, cg, HW_pad), x.dtype),
        grid=(N, nt),
        in_specs=[
            pl.BlockSpec((None, G, cg, T), lambda n, t: (n, 0, 0, t)),
            pl.BlockSpec((None, G, cg, 1), lambda n, t: (n, 0, 0, 0)),
            pl.BlockSpec((None, G, cg, 1), lambda n, t: (n, 0, 0, 0)),
        ],
        out_specs=pl.BlockSpec((None, G, cg, T), lambda n, t: (n, 0, 0, t)),
        compiler_params=pltpu.CompilerParams(
            dimension_semantics=("parallel", "parallel"),
            vmem_limit_bytes=vmem_limit),
        cost_estimate=apply_cost,
    )(x4, scale4, shift4)

    if HW_pad != HW:
        y4 = y4[..., :HW]
    return y4.reshape(N, C, H, W)


# --------------------------- pure-JAX reference check --------------------------
def ref_group_norm(x, weight, bias, group, eps=1e-5):
    n, c, h, w = x.shape
    xg = x.reshape(n, group, -1)
    m = xg.mean(-1, keepdims=True)
    v = xg.var(-1, ddof=1, keepdims=True)     # unbiased, like torch Tensor.var
    xn = ((xg - m) / jnp.sqrt(v + eps)).reshape(n, c, h, w)
    return xn * weight + bias


if __name__ == "__main__":
    key = jax.random.PRNGKey(0)
    kx, kw, kb = jax.random.split(key, 3)

    N, C, H, W = 2, 4, 16, 16
    eps = 1e-5
    x = jax.random.normal(kx, (N, C, H, W), jnp.float32)
    # module defaults are ones/zeros; perturb them to actually exercise affine
    weight = 1.0 + 0.1 * jax.random.normal(kw, (1, C, 1, 1), jnp.float32)
    bias = 0.1 * jax.random.normal(kb, (1, C, 1, 1), jnp.float32)

    # fused single-pass path, group > 1
    out = jax.block_until_ready(group_norm(x, weight, bias, group=2, eps=eps))
    ref = ref_group_norm(x, weight, bias, 2, eps)
    assert out.shape == (N, C, H, W)
    assert bool(jnp.allclose(out, ref, atol=1e-4, rtol=1e-4)), "mismatch (fused, group=2)"

    # fused path, group = 1 (LayerNorm-over-CHW flavor)
    out1 = jax.block_until_ready(group_norm(x, weight, bias, group=1, eps=eps))
    ref1 = ref_group_norm(x, weight, bias, 1, eps)
    assert bool(jnp.allclose(out1, ref1, atol=1e-4, rtol=1e-4)), "mismatch (fused, group=1)"

    # two-pass fallback (forced), aligned HW, tiny tile budget -> multi-tile accumulation
    out2 = jax.block_until_ready(
        group_norm(x, weight, bias, group=2, eps=eps,
                   force_two_pass=True, tile_budget_bytes=C * 128 * 4))
    assert bool(jnp.allclose(out2, ref, atol=1e-4, rtol=1e-4)), "mismatch (two-pass)"

    # two-pass fallback, N=1 -> exercises the per-core HW-tile split
    x_n1 = jax.random.normal(kx, (1, C, 16, 16), jnp.float32)
    out3 = jax.block_until_ready(
        group_norm(x_n1, weight, bias, group=2, eps=eps,
                   force_two_pass=True, tile_budget_bytes=C * 128 * 4))
    ref3 = ref_group_norm(x_n1, weight, bias, 2, eps)
    assert bool(jnp.allclose(out3, ref3, atol=1e-4, rtol=1e-4)), "mismatch (two-pass, N=1 split)"

    # two-pass fallback, ragged HW (10x10) -> exercises the zero-padding path
    x_rag = jax.random.normal(kx, (2, C, 10, 10), jnp.float32)
    out4 = jax.block_until_ready(
        group_norm(x_rag, weight, bias, group=2, eps=eps,
                   force_two_pass=True, tile_budget_bytes=C * 128 * 4))
    ref4 = ref_group_norm(x_rag, weight, bias, 2, eps)
    assert bool(jnp.allclose(out4, ref4, atol=1e-4, rtol=1e-4)), "mismatch (two-pass, ragged)"

    print("KERNEL_OK")
</pallas_src>

<mosaic_0001>
module attributes {stable_mosaic.version = 11 : i64} {
  func.func @kernel(%arg0: i32, %arg1: memref<1x2x2x256xf32, #tpu.memory_space<vmem>>, %arg2: memref<2x2x1xf32, #tpu.memory_space<vmem>>, %arg3: memref<2x2x1xf32, #tpu.memory_space<vmem>>, %arg4: memref<1x2x2x256xf32, #tpu.memory_space<vmem>>) attributes {dimension_semantics = [#tpu.dimension_semantics<parallel>], iteration_bounds = array<i64: 2>, scalar_prefetch = 0 : i64, scratch_operands = 0 : i64, tpu.core_type = #tpu.core_type<tc>, window_params = [{transform_indices = @transform_0, window_bounds = array<i64: 1, 2, 2, 256>}, {pipeline_mode = #tpu.pipeline_mode<synchronous>, transform_indices = @transform_1, window_bounds = array<i64: 2, 2, 1>}, {pipeline_mode = #tpu.pipeline_mode<synchronous>, transform_indices = @transform_2, window_bounds = array<i64: 2, 2, 1>}, {transform_indices = @transform_3, window_bounds = array<i64: 1, 2, 2, 256>}]} {
    %c0 = arith.constant 0 : index
    %c0_0 = arith.constant 0 : index
    %c0_1 = arith.constant 0 : index
    %c0_2 = arith.constant 0 : index
    %0 = vector.load %arg1[%c0, %c0_0, %c0_1, %c0_2] : memref<1x2x2x256xf32, #tpu.memory_space<vmem>>, vector<1x2x2x256xf32>
    %1 = vector.shape_cast %0 : vector<1x2x2x256xf32> to vector<2x2x256xf32>
    %cst = arith.constant dense<0.000000e+00> : vector<2x2xf32>
    %2 = vector.multi_reduction <add>, %1, %cst [2] : vector<2x2x256xf32> to vector<2x2xf32>
    %3 = vector.shape_cast %2 : vector<2x2xf32> to vector<2x2x1xf32>
    %cst_3 = arith.constant dense<0.000000e+00> : vector<2x1xf32>
    %4 = vector.multi_reduction <add>, %3, %cst_3 [1] : vector<2x2x1xf32> to vector<2x1xf32>
    %5 = vector.shape_cast %4 : vector<2x1xf32> to vector<2x1x1xf32>
    %cst_4 = arith.constant 0.001953125 : f32
    %6 = vector.broadcast %cst_4 : f32 to vector<2x1x1xf32>
    %7 = arith.mulf %5, %6 : vector<2x1x1xf32>
    %8 = vector.broadcast %7 : vector<2x1x1xf32> to vector<2x2x256xf32>
    %9 = arith.subf %1, %8 : vector<2x2x256xf32>
    %10 = arith.mulf %9, %9 : vector<2x2x256xf32>
    %cst_5 = arith.constant dense<0.000000e+00> : vector<2x2xf32>
    %11 = vector.multi_reduction <add>, %10, %cst_5 [2] : vector<2x2x256xf32> to vector<2x2xf32>
    %12 = vector.shape_cast %11 : vector<2x2xf32> to vector<2x2x1xf32>
    %cst_6 = arith.constant dense<0.000000e+00> : vector<2x1xf32>
    %13 = vector.multi_reduction <add>, %12, %cst_6 [1] : vector<2x2x1xf32> to vector<2x1xf32>
    %14 = vector.shape_cast %13 : vector<2x1xf32> to vector<2x1x1xf32>
    %cst_7 = arith.constant 0.00195694715 : f32
    %15 = vector.broadcast %cst_7 : f32 to vector<2x1x1xf32>
    %16 = arith.mulf %14, %15 : vector<2x1x1xf32>
    %c0_8 = arith.constant 0 : index
    %c0_9 = arith.constant 0 : index
    %c0_10 = arith.constant 0 : index
    %17 = vector.load %arg2[%c0_8, %c0_9, %c0_10] : memref<2x2x1xf32, #tpu.memory_space<vmem>>, vector<2x2x1xf32>
    %cst_11 = arith.constant 9.99999974E-6 : f32
    %18 = vector.broadcast %cst_11 : f32 to vector<2x1x1xf32>
    %19 = arith.addf %16, %18 : vector<2x1x1xf32>
    %20 = math.rsqrt %19 : vector<2x1x1xf32>
    %21 = vector.broadcast %20 : vector<2x1x1xf32> to vector<2x2x1xf32>
    %22 = arith.mulf %17, %21 : vector<2x2x1xf32>
    %23 = vector.broadcast %22 : vector<2x2x1xf32> to vector<2x2x256xf32>
    %24 = arith.mulf %9, %23 : vector<2x2x256xf32>
    %c0_12 = arith.constant 0 : index
    %c0_13 = arith.constant 0 : index
    %c0_14 = arith.constant 0 : index
    %25 = vector.load %arg3[%c0_12, %c0_13, %c0_14] : memref<2x2x1xf32, #tpu.memory_space<vmem>>, vector<2x2x1xf32>
    %26 = vector.broadcast %25 : vector<2x2x1xf32> to vector<2x2x256xf32>
    %27 = arith.addf %24, %26 : vector<2x2x256xf32>
    %c0_15 = arith.constant 0 : index
    %c0_16 = arith.constant 0 : index
    %c0_17 = arith.constant 0 : index
    %c0_18 = arith.constant 0 : index
    %28 = vector.load %arg4[%c0_15, %c0_16, %c0_17, %c0_18] : memref<1x2x2x256xf32, #tpu.memory_space<vmem>>, vector<1x2x2x256xf32>
    %29 = vector.shape_cast %28 : vector<1x2x2x256xf32> to vector<2x2x256xf32>
    %30 = vector.shape_cast %27 : vector<2x2x256xf32> to vector<1x2x2x256xf32>
    tpu.vector_store %arg4[%c0_15, %c0_16, %c0_17, %c0_18], %30 {strides = array<i32>} : memref<1x2x2x256xf32, #tpu.memory_space<vmem>>, vector<1x2x2x256xf32>,
    return
  }
  func.func @transform_0(%arg0: i32) -> (i32, i32, i32, i32) {
    %c0_i32 = arith.constant 0 : i32
    %c0_i32_0 = arith.constant 0 : i32
    %c0_i32_1 = arith.constant 0 : i32
    %c0_i32_2 = arith.constant 0 : i32
    return %arg0, %c0_i32, %c0_i32_0, %c0_i32_1 : i32, i32, i32, i32
  }
  func.func @transform_1(%arg0: i32) -> (i32, i32, i32) {
    %c0_i32 = arith.constant 0 : i32
    %c0_i32_0 = arith.constant 0 : i32
    %c0_i32_1 = arith.constant 0 : i32
    %c0_i32_2 = arith.constant 0 : i32
    return %c0_i32, %c0_i32_0, %c0_i32_1 : i32, i32, i32
  }
  func.func @transform_2(%arg0: i32) -> (i32, i32, i32) {
    %c0_i32 = arith.constant 0 : i32
    %c0_i32_0 = arith.constant 0 : i32
    %c0_i32_1 = arith.constant 0 : i32
    %c0_i32_2 = arith.constant 0 : i32
    return %c0_i32, %c0_i32_0, %c0_i32_1 : i32, i32, i32
  }
  func.func @transform_3(%arg0: i32) -> (i32, i32, i32, i32) {
    %c0_i32 = arith.constant 0 : i32
    %c0_i32_0 = arith.constant 0 : i32
    %c0_i32_1 = arith.constant 0 : i32
    %c0_i32_2 = arith.constant 0 : i32
    return %arg0, %c0_i32, %c0_i32_0, %c0_i32_1 : i32, i32, i32, i32
  }
}

</mosaic_0001>

<bundles_post_ra>
// kernel: tpu_custom_call.1
= control target key start
LH: loop header
LB: loop body
LE: loop exit
PB: predicated region body
PF: predicated region fallthrough
CT: control target
= control target key end

     0   :  { %8 = vsyncpa [#allocation3], 0  ;;  %s799_s0 = inlined_call_operand.hbm [shape: f32[2,2,2,256], index: 0, kind: input, shape index: {}]   ;;  %s800_s1 = inlined_call_operand.vmem [shape: f32[2,2,1], index: 1, kind: input, shape index: {}]   ;;  %s801_s2 = inlined_call_operand.vmem [shape: f32[2,2,1], index: 2, kind: input, shape index: {}]   ;;  %s802_s3 = inlined_call_operand.hbm [shape: f32[2,2,2,256], index: 3, kind: output, shape index: {}]  }
   0x1   :  { %10 = vsyncpa [#allocation3 + $0x1], 0 }
   0x2   :  { %11 = vsyncpa [#allocation4], 0 }
   0x3   :  { %13 = vsyncpa [#allocation4 + $0x1], 0  ;;  %s634_s12 = smov 0   ;;  %s636_s13 = smov 0  }
   0x4   :  { %s638_s14 = smov 0   ;;  %s640_s15 = smov 0  }
   0x5 LB: > { %s655_s16 = sadd.s32 4294967295, %s606_s15   ;;  %s435_s17 = sadd.s32 4294967294, %s606_s15   ;;  %s606_s15 = sphi %s640_s15, %s812_s15   ;;  %s602_s14 = sphi %s638_s14, %s811_s14   ;;  %s598_s13 = sphi %s636_s13, %s810_s13   ;;  %s594_s12 = sphi %s634_s12, %s809_s12  }
   0x6   : > { %s659_s18 = sadd.s32 1, %s606_s15   ;;  %s26_s19 = sadd.s32 1, %s602_s14 }
   0x7   : > { %s23_s20 = ssub.s32 %s606_s15, %s659_s18  ;;  %p33_p0 = scmp.ne.s32.totalorder %s602_s14, %s598_s13 }
   0x8   : > { %p24_p1 = scmp.eq.s32.totalorder %s23_s20, 0  ;;  %p34_p2 = scmp.eq.s32.totalorder %s606_s15, 0 }
   0x9   : > { %p39_p3 = scmp.ne.s32.totalorder %s598_s13, %s594_s12  ;;  %p40_p4 = scmp.eq.s32.totalorder %s655_s16, 0 }
   0xa   : > { %s671_s21 = scalar_select %p24_p1, %s602_s14, %s26_s19  }
   0xb   : > { %p673_p5 = por %p34_p2, %p33_p0  ;;  %p677_p6 = por %p40_p4, %p39_p3 }
   0xc   : > { %p105_p7 = scmp.eq.s32.totalorder %s655_s16, 1  ;;  %p111_p8 = scmp.eq.s32.totalorder %s435_s17, 1 }
   0xd   : > { %p463_p10 = scmp.lt.s32.totalorder %s606_s15, 2  ;;  %s137_s26 = sand.u32 1, %s602_s14  }
   0xe   : > { %p684_p11 = por %p105_p7, %p33_p0  ;;  %p688_p12 = por %p111_p8, %p39_p3 }
   0xf   : > { %s449_s27 = sshll.u32 %s606_s15, 3  ;;  %s438_s28 = sshll.u32 %s137_s26, 3 }
  0x10   : > { %s146_s4 = scalar_lea.hbm %s799_s0, %s449_s27  ;;  %s141_s6 = scalar_lea.vmem [#allocation2], %s438_s28 }
  0x11   : > { %s147_s5 = sshll.u32 %s146_s4, 4  ;;  %s149_s7 = sshll.u32 %s141_s6, 4  ;;  %s148_s5 = int_to_ptr.hbm [resolvable:$true] %s147_s5  ;;  %s150_s7 = int_to_ptr.vmem [resolvable:$true] %s149_s7 }
  0x12   : > { %p699_p13 = pnand %p463_p10, %p673_p5  ;;  %p441_p0 = scmp.ge.s32.totalorder %s606_s15, 1 }
  0x13   : > { %p157_p1 = scmp.lt.s32.totalorder %s606_s15, 3  ;;  %s138_s9 = scalar_lea.sflag [#allocation3], %s137_s26 }
  0x14   : > { %s510_s10 = sshra.s32 %s148_s5, 4  ;;  %p514_p3 = pneg %p699_p13  ;;  %s511_s10 = int_to_ptr.hbm [resolvable:$true] %s510_s10 }
  0x15   : > { %s512_s11 = scalar_lea.hbm %s511_s10, 8  ;;  %s517_s20 = scalar_lea.hbm %s799_s0, 16 }
  0x16   : > { %p513_p2 = scmp.ne.s32.totalorder %s511_s10, %s512_s11  ;;  %p518_p5 = scmp.lt.s32.totalorder %s511_s10, %s799_s0 }
  0x17   : > { %p519_p8 = scmp.lt.s32.totalorder %s517_s20, %s512_s11 }
  0x18   : > { %p515_p4 = pnand %p514_p3, %p513_p2 }
  0x19   : > { %p520_p10 = por %p519_p8, %p518_p5 }
  0x1a   : > { %p516_p7 = pneg %p515_p4 }
  0x1c   : > { %p521_p9 = pnand %p520_p10, %p516_p7 }
  0x1e   : > { %524 = shalt.err (!%p521_p9)
}
  0x1f   : > { %s608_s26 = smov 64   ;;  %s609_s28 = smov 4  }
  0x20   : > { %458 = dma.hbm_to_vmem [thread:$0]  (!%p699_p13), %s148_s5, 128, %s150_s7, %s138_s9, %s608_s26, %s608_s26, %s609_s28  }
  0x21   : > { %p158_p2 = pnand %p441_p0, %p157_p1 }
  0x22   : > { %s720_s29 = sand.u32 (!%p158_p2), 1, %s598_s13  }
  0x23   : > { %161 = sbr.rel (%p158_p2) target bundleno = 461 (0x1cd), region = 32  ;;  %s442_s30 = sshll.u32 (!%p158_p2), %s720_s29, 3 }
  0x24   : > { %s164_s4 = scalar_lea.sflag (!%p158_p2), [#allocation3], %s720_s29  ;;  %s167_s6 = scalar_lea.vmem (!%p158_p2), [#allocation2], %s442_s30 }
  0x28   : > { %585 = dma.done.wait (%p677_p6), %s164_s4, 128  }
  0x29   : > { %587 = vsyncadd (%p677_p6), %s164_s4, 4294967168  ;;  %v191_v0 = vld [vmem:[%s167_s6] sm:$0xf]  ;;  %v192_v1 = vld [vmem:[%s167_s6 + $0x4] sm:$0xf]  ;;  %vm206_vm0 = vcmask 1041408  }
  0x2a   : > { %195 = vst [vmem:[#allocation1] ss:$4 sm:$0xff] %v191_v0  ;;  %v610_v44 = vmov 0   ;;  %v322_v45 = vld [vmem:[%s801_s2] sm:$0x3]  ;;  %s450_s19 = sshll.u32 %s655_s16, 3 }
  0x2b   : > { %199 = vst [vmem:[#allocation1 + $0x20] ss:$4 sm:$0xff] %v192_v1  ;;  %504 = vset.pattern.permute.xlu0 %v610_v44  ;;  %505 = vset.pattern.permute.xlu1 %v610_v44  ;;  %v323_v46 = vld [vmem:[%s801_s2 + $0x2] sm:$0x3]  ;;  %s358_s27 = scalar_lea.hbm %s802_s3, %s450_s19  ;;  %s190_s26 = scalar_lea.vmem [#allocation5], %s442_s30 }
  0x2c   : > { %503 = vset.pattern.permute.xlu2 %v610_v44  ;;  %s359_s28 = sshll.u32 %s190_s26, 4  ;;  %s361_s4 = sshll.u32 %s358_s27, 4  ;;  %s360_s28 = int_to_ptr.vmem [resolvable:$true] %s359_s28  ;;  %s362_s4 = int_to_ptr.hbm [resolvable:$true] %s361_s4 }
  0x2d   : > { %s347_s16 = scalar_lea.sflag [#allocation4], %s720_s29  ;;  %s554_s6 = sshra.s32 %s362_s4, 4  ;;  %s555_s6 = int_to_ptr.hbm [resolvable:$true] %s554_s6 }
  0x2e   : > { %s556_s23 = scalar_lea.hbm %s555_s6, 8  ;;  %s560_s7 = scalar_lea.hbm %s802_s3, 16 }
  0x2f   : > { %p557_p6 = scmp.ne.s32.totalorder %s555_s6, %s556_s23  ;;  %p561_p0 = scmp.lt.s32.totalorder %s555_s6, %s802_s3 }
  0x30   : > { %p562_p1 = scmp.lt.s32.totalorder %s560_s7, %s556_s23 }
  0x31   : > { %v196_v2 = vld.sshfl [vmem:[#allocation1] sm:$0xff pattern:$0x73625140]  ;;  %v197_v3 = vld.sshfl [vmem:[#allocation1 + $0x8] sm:$0xff pattern:$0x73625140]  ;;  %p558_p9 = pnand %p557_p6, %p684_p11 }
  0x32   : > { %v207_v4 = vsel %vm206_vm0, %v196_v2, 0.0  ;;  %v208_v5 = vsel %vm206_vm0, %v197_v3, 0.0  ;;  %v200_v7 = vld.sshfl [vmem:[#allocation1 + $0x20] sm:$0xff pattern:$0x73625140]  ;;  %p563_p3 = por %p562_p1, %p561_p0 }
  0x33   : > { %v209_v6 = vadd.f32 %v208_v5, %v207_v4  ;;  %v201_v8 = vld.sshfl [vmem:[#allocation1 + $0x28] sm:$0xff pattern:$0x73625140]  ;;  %v212_v9 = vsel %vm206_vm0, %v200_v7, 0.0  ;;  %p559_p13 = pneg %p558_p9 }
  0x34   : > { %v213_v10 = vsel %vm206_vm0, %v201_v8, 0.0 }
  0x35   : > { %210 = vadd.xlane.f32.xlu0 %v209_v6  ;;  %v214_v11 = vadd.f32 %v213_v10, %v212_v9  ;;  %v276_v10 = vld [vmem:[%s800_s1] sm:$0x3]  ;;  %p564_p4 = pnand %p563_p3, %p559_p13 }
  0x3d   : > { %215 = vadd.xlane.f32.xlu0 %v214_v11 }
  0x51   : > { %326 = vperm.xlu0 %504, %v322_v45  }
  0xa8   : > { %v211_v12 = vpop.xlane.xlu0 %210 }
  0xa9   : > { %v217_v13 = vsel %vm206_vm0, %v211_v12, 0.0 }
  0xaa   : > { %v218_v14 = vrot.slane %v217_v13, 4 }
  0xac   : > { %v219_v15 = vadd.f32 %v218_v14, %v217_v13 }
  0xae   : > { %v220_v16 = vrot.slane %v219_v15, 2 }
  0xb0   : > { %v221_v17 = vadd.f32 %v220_v16, %v219_v15  ;;  %v216_v18 = vpop.xlane.xlu0 %215 }
  0xb1   : > { %v224_v19 = vsel %vm206_vm0, %v216_v18, 0.0 }
  0xb2   : > { %v222_v20 = vrot.slane %v221_v17, 1  ;;  %v225_v21 = vrot.slane %v224_v19, 4 }
  0xb4   : > { %v223_v22 = vadd.f32 %v222_v20, %v221_v17  ;;  %v226_v23 = vadd.f32 %v225_v21, %v224_v19  ;;  %v277_v17 = vld [vmem:[%s800_s1 + $0x2] sm:$0x3]  ;;  %v611_v21 = vmov 269488144  }
  0xb6   : > { %v231_v24 = vmul.f32 0.001953125, %v223_v22  ;;  %v227_v25 = vrot.slane %v226_v23, 2  ;;  %v311_v22 = vunpack.c.l.s4 %v611_v21 }
  0xb8   : > { %v736_v26 = vsub.f32 %v191_v0, %v231_v24  ;;  %v228_v27 = vadd.f32 %v227_v25, %v226_v23  ;;  %v312_v23 = vunpack.c.0.s8 %v311_v22 }
  0xba   : > { %v235_v28 = vmul.f32 %v736_v26, %v736_v26  ;;  %v229_v29 = vrot.slane %v228_v27, 1 }
  0xbc   : > { %239 = vst [vmem:[#allocation1] ss:$4 sm:$0xff] %v235_v28  ;;  %v230_v30 = vadd.f32 %v229_v29, %v228_v27 }
  0xbe   : > { %v232_v31 = vmul.f32 0.001953125, %v230_v30 }
  0xc0   : > { %v740_v32 = vsub.f32 %v192_v1, %v232_v31 }
  0xc2   : > { %v236_v33 = vmul.f32 %v740_v32, %v740_v32 }
  0xc3   : > { %v240_v34 = vld.sshfl [vmem:[#allocation1] sm:$0xff pattern:$0x73625140]  ;;  %v241_v35 = vld.sshfl [vmem:[#allocation1 + $0x8] sm:$0xff pattern:$0x73625140]  ;;  %v327_v24 = vpop.permute.xlu0 %326 }
  0xc4   : > { %243 = vst [vmem:[#allocation1 + $0x20] ss:$4 sm:$0xff] %v236_v33  ;;  %v250_v36 = vsel %vm206_vm0, %v240_v34, 0.0  ;;  %v251_v37 = vsel %vm206_vm0, %v241_v35, 0.0  ;;  %v335_v28 = vperm.slane %v327_v24, %v312_v23 }
  0xc5   : > { %v252_v38 = vadd.f32 %v251_v37, %v250_v36 }
  0xc7   : > { %253 = vadd.xlane.f32.xlu1 %v252_v38 }
  0xcb   : > { %v244_v39 = vld.sshfl [vmem:[#allocation1 + $0x20] sm:$0xff pattern:$0x73625140]  ;;  %v245_v40 = vld.sshfl [vmem:[#allocation1 + $0x28] sm:$0xff pattern:$0x73625140] }
  0xcc   : > { %v255_v41 = vsel %vm206_vm0, %v244_v39, 0.0  ;;  %v256_v42 = vsel %vm206_vm0, %v245_v40, 0.0 }
  0xcd   : > { %v257_v43 = vadd.f32 %v256_v42, %v255_v41 }
  0xcf   : > { %258 = vadd.xlane.f32.xlu1 %v257_v43 }
  0xe8   : > { %330 = vperm.xlu1 %505, %v323_v46  }
 0x13a   : > { %v254_v47 = vpop.xlane.xlu1 %253 }
 0x13b   : > { %v260_v48 = vsel %vm206_vm0, %v254_v47, 0.0 }
 0x13c   : > { %v261_v49 = vrot.slane %v260_v48, 4 }
 0x13e   : > { %v262_v50 = vadd.f32 %v261_v49, %v260_v48 }
 0x140   : > { %v263_v51 = vrot.slane %v262_v50, 2 }
 0x142   : > { %v264_v52 = vadd.f32 %v263_v51, %v262_v50  ;;  %v259_v53 = vpop.xlane.xlu1 %258 }
 0x143   : > { %v267_v54 = vsel %vm206_vm0, %v259_v53, 0.0 }
 0x144   : > { %v265_v55 = vrot.slane %v264_v52, 1  ;;  %v268_v56 = vrot.slane %v267_v54, 4 }
 0x146   : > { %v266_v57 = vadd.f32 %v265_v55, %v264_v52  ;;  %v269_v58 = vadd.f32 %v268_v56, %v267_v54 }
 0x148   : > { %v274_v59 = vmul.f32 0.0019569471, %v266_v57  ;;  %v270_v60 = vrot.slane %v269_v58, 2 }
 0x14a   : > { %v278_v61 = vadd.f32 1e-05, %v274_v59  ;;  %v271_v62 = vadd.f32 %v270_v60, %v269_v58 }
 0x14c   : > { %506 = vrsqrt.f32 %v278_v61  ;;  %v272_v63 = vrot.slane %v271_v62, 1  ;;  %vm286_vm2 = vweird.f32 %v278_v61 }
 0x14e   : > { %v273_v0 = vadd.f32 %v272_v63, %v271_v62 }
 0x150   : > { %v275_v1 = vmul.f32 0.0019569471, %v273_v0 }
 0x152   : > { %v507_v2 = vpop.eup %506  ;;  %v279_v3 = vadd.f32 1e-05, %v275_v1 }
 0x153   : > { %v281_v4 = vmul.f32 %v507_v2, %v278_v61  ;;  %vm287_vm1 = vweird.f32 %v507_v2 }
 0x154   : > { %508 = vrsqrt.f32 %v279_v3  ;;  %vm288_vm3 = vmor %vm286_vm2, %vm287_vm1  ;;  %vm296_vm5 = vweird.f32 %v279_v3 }
 0x155   : > { %v282_v5 = vmul.f32 %v507_v2, %v281_v4 }
 0x157   : > { %v283_v6 = vmul.f32 0.5, %v282_v5 }
 0x159   : > { %v284_v7 = vsub.f32 1.5, %v283_v6 }
 0x15a   : > { %v509_v8 = vpop.eup %508  ;;  %v331_v31 = vpop.permute.xlu1 %330 }
 0x15b   : > { %v291_v9 = vmul.f32 %v509_v8, %v279_v3  ;;  %v285_v11 = vmul.f32 %v507_v2, %v284_v7  ;;  %vm297_vm4 = vweird.f32 %v509_v8  ;;  %v339_v35 = vperm.slane %v331_v31, %v312_v23 }
 0x15c   : > { %vm298_vm6 = vmor %vm296_vm5, %vm297_vm4 }
 0x15d   : > { %v289_v12 = vsel %vm288_vm3, %v507_v2, %v285_v11  ;;  %v292_v13 = vmul.f32 %v509_v8, %v291_v9 }
 0x15e   : > { %v300_v14 = vmul.f32 %v289_v12, %v276_v10 }
 0x15f   : > { %v293_v15 = vmul.f32 0.5, %v292_v13 }
 0x160   : > { %304 = vperm.xlu2 %503, %v300_v14  }
 0x161   : > { %v294_v16 = vsub.f32 1.5, %v293_v15 }
 0x163   : > { %v295_v18 = vmul.f32 %v509_v8, %v294_v16 }
 0x165   : > { %v299_v19 = vsel %vm298_vm6, %v509_v8, %v295_v18 }
 0x166   : > { %v301_v20 = vmul.f32 %v299_v19, %v277_v17 }
 0x168   : > { %308 = vperm.xlu2 %503, %v301_v20  }
 0x1ba   : > { %v305_v25 = vpop.permute.xlu2 %304 }
 0x1bb   : > { %v313_v27 = vperm.slane %v305_v25, %v312_v23 }
 0x1bd   : > { %v320_v29 = vmul.f32 %v313_v27, %v736_v26 }
 0x1bf   : > { %v342_v30 = vadd.f32 %v335_v28, %v320_v29 }
 0x1c1   : > { %344 = vst [vmem:[%s190_s26] sm:$0xf] %v342_v30 }
 0x1c2   : > { %v309_v33 = vpop.permute.xlu2 %308 }
 0x1c3   : > { %v317_v34 = vperm.slane %v309_v33, %v312_v23 }
 0x1c5   : > { %v321_v26 = vmul.f32 %v317_v34, %v740_v32 }
 0x1c7   : > { %v343_v36 = vadd.f32 %v339_v35, %v321_v26 }
 0x1c9   : > { %345 = vst [vmem:[%s190_s26 + $0x4] sm:$0xf] %v343_v36 }
 0x1ca   : > { %567 = shalt.err (!%p564_p4)
}
 0x1cb   : > { %s612_s29 = smov 64   ;;  %s613_s10 = smov 4  }
 0x1cc   : > { %453 = dma.vmem_to_hbm [thread:$0]  (%p684_p11), %s360_s28, 128, %s362_s4, %s347_s16, %s612_s29, %s612_s29, %s613_s10  }
 0x1cd PF: > { %s376_s11 = sand.u32 1, %s594_s12   ;;  %p808_p7 = scmp.ge.s32.totalorder %s606_s15, 2 }
 0x1ce   : > { %s377_s17 = scalar_lea.sflag [#allocation4], %s376_s11 }
 0x1cf   : > { %p460_p5 = pnand %p808_p7, %p688_p12 }
 0x1d1   : > { %p461_p8 = pneg %p460_p5 }
 0x1d3   : > { %589 = dma.done.wait (%p461_p8), %s377_s17, 128  }
 0x1d4   : > { %591 = vsyncadd (%p461_p8), %s377_s17, 4294967168  ;;  %p16_p10 = scmp.ge.s32.totalorder %s659_s18, 4   ;;  %s809_s12 = smov %s598_s13 }
 0x1d5   : > { %s810_s13 = smov %s602_s14  ;;  %s811_s14 = smov %s671_s21 }
 0x1d6   : > { %s812_s15 = smov %s659_s18  ;;  %18 = sbr.rel (!%p16_p10) target bundleno = 5 (0x5), region = 79 }
 0x1db   :  { %383 = vsyncpa [#allocation3], 1 }
 0x1dc   :  { %385 = vsyncpa [#allocation3 + $0x1], 1 }
 0x1dd   :  { %386 = vsyncpa [#allocation4], 1 }
 0x1de   :  { %388 = vsyncpa [#allocation4 + $0x1], 1 }

</bundles_post_ra>
